<compile_context>
chip_gen: v5e
topology: v5e:2x2
jax: 0.10.0
libtpu: 0.0.40
codegen_flags: <defaults>
</compile_context>

<pallas_src>
import functools

import jax
import jax.numpy as jnp
from jax import lax
from jax.experimental import pallas as pl
from jax.experimental.pallas import tpu as pltpu

LANE = 128


def _round_up(v, m):
    return (v + m - 1) // m * m


def _vmem_limit_bytes():
    # Cap well below physical VMEM (v7x only has 64 MiB/TC); generous on v5e/v6e.
    cap = None
    try:
        cap = getattr(pltpu.get_tpu_info(), "vmem_capacity_bytes", None)
    except Exception:
        cap = None
    if not cap:
        cap = 128 * 1024 * 1024
    return int(min(48 * 1024 * 1024, (3 * cap) // 4))


_VMEM_LIMIT = _vmem_limit_bytes()


def _pick_tn(c):
    # Fallback N-tiling when the whole weight would not comfortably fit in VMEM.
    for cand in (512, 384, 256, 128):
        if c % cand == 0:
            return cand
    return c


def _pick_band(Ho, Wo, target_rows=512):
    """Pick output-row band height bh (bh | Ho, bh*Wo % 8 == 0, bh*Wo <= target)."""
    best = None
    for bh in range(1, Ho + 1):
        if Ho % bh:
            continue
        rows = bh * Wo
        if rows % 8 != 0 and bh != Ho:
            continue
        if rows <= target_rows:
            best = bh
    if best is None:
        best = Ho  # whole image as one band (block == full extent, always legal)
    return best


# --------------------------------------------------------------------------
# Pallas kernels
# --------------------------------------------------------------------------
def _mm_bias_kernel(x_ref, w_ref, b_ref, o_ref, *, apply_relu):
    # out = maybe_relu(x @ w + b); BN scale already folded into w.
    acc = jnp.dot(x_ref[...], w_ref[...], preferred_element_type=jnp.float32)
    out = acc + b_ref[...]
    if apply_relu:
        out = jnp.maximum(out, 0.0)
    o_ref[...] = out.astype(o_ref.dtype)


def _mm_bias_add_relu_kernel(x_ref, w_ref, b_ref, res_ref, o_ref):
    # out = relu(x @ w + b + residual)
    acc = jnp.dot(x_ref[...], w_ref[...], preferred_element_type=jnp.float32)
    out = acc + b_ref[...] + res_ref[...].astype(jnp.float32)
    o_ref[...] = jnp.maximum(out, 0.0).astype(o_ref.dtype)


def _conv3x3_bias_relu_kernel(x_ref, w_ref, b_ref, o_ref, xp_ref, col_ref,
                              *, stride, bh, Wo):
    """Fused 3x3 "same" conv + bias + ReLU for one (image, row-band) grid step.

      x_ref  : (1, H, W, C)  full image (block index constant along the band axis,
                              so it is DMA'd once per image)
      w_ref  : (9*C, P)      tap-major folded weight (kh*3+kw blocks of C rows)
      b_ref  : (1, P)        f32 bias (BN folded)
      o_ref  : (1, bh*Wo, P) output rows of this band
      xp_ref : (Ho*stride+2, Wp, C) zero-padded image scratch (persists per image)
      col_ref: (bh*Wo, 9*C)  per-band im2col scratch

    One K=9C matmul per band keeps the MXU wide and avoids re-streaming a large
    f32 accumulator through VMEM for every tap.
    """
    _, H, W, C = x_ref.shape
    Hp, Wp, _ = xp_ref.shape
    band = pl.program_id(1)

    @pl.when(band == 0)
    def _():
        dt = xp_ref.dtype
        # Zero only the border strips (top/bottom halo rows, left column,
        # right padding columns), then write the image interior once per image.
        xp_ref[0:1, :, :] = jnp.zeros((1, Wp, C), dt)
        xp_ref[H + 1:Hp, :, :] = jnp.zeros((Hp - H - 1, Wp, C), dt)
        xp_ref[1:H + 1, 0:1, :] = jnp.zeros((H, 1, C), dt)
        xp_ref[1:H + 1, W + 1:Wp, :] = jnp.zeros((H, Wp - W - 1, C), dt)
        xp_ref[1:H + 1, 1:W + 1, :] = x_ref[0]

    rows = bh * Wo
    row0 = band * (bh * stride)          # first padded row touched by this band
    for kh in range(3):
        for kw in range(3):
            tap = kh * 3 + kw
            if stride == 1:
                patch = xp_ref[pl.ds(row0 + kh, bh), kw:kw + Wo, :]
            else:
                # Strided row read on the (non-tiled) leading dim; the column
                # stride is applied in-register via reshape + static select.
                rs = xp_ref[pl.ds(row0 + kh, bh, stride=stride),
                            kw:kw + Wo * stride, :]
                patch = rs.reshape(bh, Wo, stride, C)[:, :, 0, :]
            col_ref[:, tap * C:(tap + 1) * C] = patch.reshape(rows, C)

    acc = jnp.dot(col_ref[...], w_ref[...], preferred_element_type=jnp.float32)
    o_ref[0] = jnp.maximum(acc + b_ref[...], 0.0).astype(o_ref.dtype)


# --------------------------------------------------------------------------
# Wrappers around pallas_call
# --------------------------------------------------------------------------
def matmul_bias(x, w, bias, *, relu, residual=None,
                out_dtype=jnp.bfloat16, tm_target=512):
    """out = maybe_relu(x @ w + bias [+ residual]); BN scale folded into w."""
    M, K = x.shape
    Kw, C = w.shape
    assert K == Kw and bias.shape == (1, C)
    if residual is not None:
        assert relu, "fused residual path always applies the trailing ReLU"
        assert residual.shape == (M, C)

    tm = min(tm_target, _round_up(M, 8))
    Mp = _round_up(M, tm)
    if Mp != M:  # pad the tail block instead of collapsing to a single huge tile
        x = jnp.pad(x, ((0, Mp - M), (0, 0)))
        if residual is not None:
            residual = jnp.pad(residual, ((0, Mp - M), (0, 0)))

    # Keep the whole folded weight resident when it fits (always true for
    # ResNet bottlenecks, <= 8 MiB bf16) so it is DMA'd once per call.
    tn = C if (K * C * w.dtype.itemsize) <= 8 * 1024 * 1024 else _pick_tn(C)
    grid = (Mp // tm, C // tn)

    x_spec = pl.BlockSpec((tm, K), lambda i, j: (i, 0))
    w_spec = pl.BlockSpec((K, tn), lambda i, j: (0, j))
    b_spec = pl.BlockSpec((1, tn), lambda i, j: (0, j))
    o_spec = pl.BlockSpec((tm, tn), lambda i, j: (i, j))
    out_shape = jax.ShapeDtypeStruct((Mp, C), out_dtype)

    res_bytes = residual.size * residual.dtype.itemsize if residual is not None else 0
    cost = pl.CostEstimate(
        flops=int(2 * Mp * K * C),
        transcendentals=0,
        bytes_accessed=int(x.size * x.dtype.itemsize + w.size * w.dtype.itemsize
                           + bias.size * bias.dtype.itemsize
                           + Mp * C * jnp.dtype(out_dtype).itemsize + res_bytes))
    cparams = pltpu.CompilerParams(
        dimension_semantics=("parallel", "parallel"),
        vmem_limit_bytes=_VMEM_LIMIT)

    if residual is None:
        kern = functools.partial(_mm_bias_kernel, apply_relu=relu)
        in_specs = [x_spec, w_spec, b_spec]
        args = (x, w, bias)
    else:
        kern = _mm_bias_add_relu_kernel
        in_specs = [x_spec, w_spec, b_spec,
                    pl.BlockSpec((tm, tn), lambda i, j: (i, j))]
        args = (x, w, bias, residual)

    out = pl.pallas_call(
        kern,
        out_shape=out_shape,
        grid_spec=pltpu.PrefetchScalarGridSpec(
            num_scalar_prefetch=0, grid=grid,
            in_specs=in_specs, out_specs=o_spec),
        compiler_params=cparams,
        cost_estimate=cost,
    )(*args)
    return out[:M] if Mp != M else out


def conv3x3_bias_relu(x_nhwc, w_col, bias, stride):
    """3x3 conv (pad=1, stride) + bias + ReLU, banded im2col per image."""
    N, H, W, C = x_nhwc.shape
    K9, P = w_col.shape
    assert K9 == 9 * C and bias.shape == (1, P)
    Ho = (H - 1) // stride + 1
    Wo = (W - 1) // stride + 1
    bh = _pick_band(Ho, Wo)
    nb = Ho // bh
    Hp = Ho * stride + 2                      # covers the halo + stride over-read
    Wp = _round_up(Wo * stride + 2, 8)        # sublane-aligned scratch width

    kern = functools.partial(_conv3x3_bias_relu_kernel,
                             stride=stride, bh=bh, Wo=Wo)
    cost = pl.CostEstimate(
        flops=int(2 * N * Ho * Wo * 9 * C * P),
        transcendentals=0,
        bytes_accessed=int(x_nhwc.size * x_nhwc.dtype.itemsize
                           + w_col.size * w_col.dtype.itemsize
                           + bias.size * bias.dtype.itemsize
                           + N * Ho * Wo * P * 2))

    return pl.pallas_call(
        kern,
        out_shape=jax.ShapeDtypeStruct((N, Ho * Wo, P), jnp.bfloat16),
        grid_spec=pltpu.PrefetchScalarGridSpec(
            num_scalar_prefetch=0, grid=(N, nb),
            in_specs=[pl.BlockSpec((1, H, W, C), lambda n, b: (n, 0, 0, 0)),
                      pl.BlockSpec((9 * C, P), lambda n, b: (0, 0)),
                      pl.BlockSpec((1, P), lambda n, b: (0, 0))],
            out_specs=pl.BlockSpec((1, bh * Wo, P), lambda n, b: (n, b, 0)),
            scratch_shapes=[pltpu.VMEM((Hp, Wp, C), jnp.bfloat16),
                            pltpu.VMEM((bh * Wo, 9 * C), jnp.bfloat16)]),
        compiler_params=pltpu.CompilerParams(
            # TODO(synk): make each band self-contained (band-local halo fill)
            # so the band axis can also be "parallel" for v7x dual-TC at batch 1.
            dimension_semantics=("parallel", "arbitrary"),
            vmem_limit_bytes=_VMEM_LIMIT),
        cost_estimate=cost,
    )(x_nhwc, w_col, bias)


# --------------------------------------------------------------------------
# Parameter preparation: fold eval-mode BN into weights, pad channels, bf16
# --------------------------------------------------------------------------
def fold_bn(gamma, beta, mean, var, eps=1e-5):
    scale = gamma / jnp.sqrt(var + eps)
    return scale, beta - mean * scale


def make_kernel_params(torch_params, in_planes, planes, expansion=4):
    cout = expansion * planes
    cin_p = _round_up(in_planes, LANE)
    p_p = _round_up(planes, LANE)
    cout_p = _round_up(cout, LANE)

    def pad_mat(w, rows, cols):
        return jnp.pad(w, ((0, rows - w.shape[0]),
                           (0, cols - w.shape[1]))).astype(jnp.bfloat16)

    def pad_bias(b, cols):
        return jnp.pad(b, (0, cols - b.shape[0])).reshape(1, cols).astype(jnp.float32)

    kp = {"cin": in_planes, "cout": cout}

    s1, b1 = fold_bn(*torch_params["bn1"])
    w1 = torch_params["w1"].reshape(planes, in_planes).T * s1[None, :]      # (Cin, P)
    kp["w1"], kp["b1"] = pad_mat(w1, cin_p, p_p), pad_bias(b1, p_p)

    s2, b2 = fold_bn(*torch_params["bn2"])
    # (O, I, KH, KW) -> (KH, KW, I, O) -> (9, I, O); tap index = kh*3 + kw.
    w2 = jnp.transpose(torch_params["w2"], (2, 3, 1, 0)).reshape(9, planes, planes)
    w2 = w2 * s2[None, None, :]
    w2 = jnp.pad(w2, ((0, 0), (0, p_p - planes), (0, p_p - planes)))
    kp["w2"] = w2.reshape(9 * p_p, p_p).astype(jnp.bfloat16)                # (9C, P)
    kp["b2"] = pad_bias(b2, p_p)

    s3, b3 = fold_bn(*torch_params["bn3"])
    w3 = torch_params["w3"].reshape(cout, planes).T * s3[None, :]           # (P, Cout)
    kp["w3"], kp["b3"] = pad_mat(w3, p_p, cout_p), pad_bias(b3, cout_p)

    if "ws" in torch_params:
        ss, bs = fold_bn(*torch_params["bns"])
        ws = torch_params["ws"].reshape(cout, in_planes).T * ss[None, :]    # (Cin, Cout)
        kp["ws"], kp["bs"] = pad_mat(ws, cin_p, cout_p), pad_bias(bs, cout_p)
    return kp


# --------------------------------------------------------------------------
# Forward pass
# --------------------------------------------------------------------------
def bottleneck_forward_nhwc(x_nhwc, kp, stride):
    N, H, W, Cin = x_nhwc.shape
    cin_p, p_p = kp["w1"].shape
    Ho = (H - 1) // stride + 1
    Wo = (W - 1) // stride + 1

    # Channel-pad once and drop to bf16. In a full network this padded NHWC
    # layout would be carried across blocks (pad/unpad only at model edges).
    x_p = jnp.pad(x_nhwc, ((0, 0), (0, 0), (0, 0),
                           (0, cin_p - Cin))).astype(jnp.bfloat16)
    xf = x_p.reshape(N * H * W, cin_p)

    # conv1 (1x1) + bn1 + relu
    # TODO(synk): optionally produce conv1 output per row-band inside the conv2
    # kernel (emit_pipeline) to avoid the y1 HBM round trip at small batch.
    y1 = matmul_bias(xf, kp["w1"], kp["b1"], relu=True)
    y1 = y1.reshape(N, H, W, p_p)

    # conv2 (3x3, stride, pad=1) + bn2 + relu — banded im2col, no HBM im2col
    y2 = conv3x3_bias_relu(y1, kp["w2"], kp["b2"], stride)
    y2f = y2.reshape(N * Ho * Wo, p_p)

    # shortcut branch
    if "ws" in kp:
        if stride == 1:
            xs = xf                               # no extra copy
        else:
            # TODO(synk): read the strided rows through the shortcut kernel's
            # BlockSpec instead of materializing this strided copy in HBM.
            xs = x_p[:, ::stride, ::stride, :].reshape(N * Ho * Wo, cin_p)
        res = matmul_bias(xs, kp["ws"], kp["bs"], relu=False)
    else:
        assert stride == 1 and kp["cin"] == kp["cout"], \
            "identity shortcut shape mismatch"
        res = xf

    # conv3 (1x1) + bn3 + residual add + relu — fully fused, bf16 writeback
    y3 = matmul_bias(y2f, kp["w3"], kp["b3"], relu=True, residual=res,
                     out_dtype=jnp.bfloat16)
    return y3[:, :kp["cout"]].reshape(N, Ho, Wo, kp["cout"])


def bottleneck_forward(x_nchw, kp, stride):
    # NOTE: in a full ResNet these NCHW<->NHWC transposes would be hoisted to
    # the model boundary; the block itself stays NHWC end to end.
    x = jnp.transpose(x_nchw, (0, 2, 3, 1)).astype(jnp.float32)
    out = bottleneck_forward_nhwc(x, kp, stride)
    return jnp.transpose(out, (0, 3, 1, 2)).astype(jnp.float32)


# --------------------------------------------------------------------------
# Deterministic parameters + pure-JAX reference (matches the PyTorch forward)
# --------------------------------------------------------------------------
def make_torch_params(key, in_planes, planes, stride, expansion=4):
    cout = expansion * planes
    keys = jax.random.split(key, 8)

    def conv_w(k, o, i, kh, kw):
        return (0.1 * jax.random.normal(k, (o, i, kh, kw))).astype(jnp.float32)

    def bn_p(k, c):
        k1, k2, k3, k4 = jax.random.split(k, 4)
        gamma = jax.random.uniform(k1, (c,), minval=0.5, maxval=1.5)
        beta = jax.random.uniform(k2, (c,), minval=-0.2, maxval=0.2)
        mean = jax.random.uniform(k3, (c,), minval=-0.2, maxval=0.2)
        var = jax.random.uniform(k4, (c,), minval=0.5, maxval=1.5)
        return (gamma.astype(jnp.float32), beta.astype(jnp.float32),
                mean.astype(jnp.float32), var.astype(jnp.float32))

    tp = {
        "w1": conv_w(keys[0], planes, in_planes, 1, 1),
        "bn1": bn_p(keys[1], planes),
        "w2": conv_w(keys[2], planes, planes, 3, 3),
        "bn2": bn_p(keys[3], planes),
        "w3": conv_w(keys[4], cout, planes, 1, 1),
        "bn3": bn_p(keys[5], cout),
    }
    if (stride != 1) or (in_planes != cout):
        tp["ws"] = conv_w(keys[6], cout, in_planes, 1, 1)
        tp["bns"] = bn_p(keys[7], cout)
    return tp


def reference_forward(x_nchw, tp, stride, eps=1e-5):
    def conv(x, w, s, pad):
        return lax.conv_general_dilated(
            x, w, (s, s), [(pad, pad), (pad, pad)],
            dimension_numbers=("NCHW", "OIHW", "NCHW"))

    def bn(x, p):
        gamma, beta, mean, var = p
        inv = gamma / jnp.sqrt(var + eps)
        return x * inv[None, :, None, None] + (beta - mean * inv)[None, :, None, None]

    out = jax.nn.relu(bn(conv(x_nchw, tp["w1"], 1, 0), tp["bn1"]))
    out = jax.nn.relu(bn(conv(out, tp["w2"], stride, 1), tp["bn2"]))
    out = bn(conv(out, tp["w3"], 1, 0), tp["bn3"])
    sc = bn(conv(x_nchw, tp["ws"], stride, 0), tp["bns"]) if "ws" in tp else x_nchw
    return jax.nn.relu(out + sc)


if __name__ == "__main__":
    key = jax.random.PRNGKey(0)
    #            N, in_planes, planes, stride,  H,  W
    cases = [
        (2,  4, 4, 1, 32, 32),   # projection shortcut, multi-band conv2
        (2,  8, 4, 2, 16, 16),   # projection shortcut + stride-2 conv2/shortcut
        (2, 16, 4, 1, 16, 16),   # identity shortcut
        (2,  8, 4, 2, 15, 15),   # odd spatial size with stride 2
    ]
    for idx, (N, in_planes, planes, stride, H, W) in enumerate(cases):
        key, kx, kparam = jax.random.split(key, 3)
        x = jax.random.normal(kx, (N, in_planes, H, W), dtype=jnp.float32)
        torch_params = make_torch_params(kparam, in_planes, planes, stride)
        kernel_params = make_kernel_params(torch_params, in_planes, planes)

        out = jax.block_until_ready(bottleneck_forward(x, kernel_params, stride))
        ref = reference_forward(x, torch_params, stride)

        Ho = (H - 1) // stride + 1
        Wo = (W - 1) // stride + 1
        assert out.shape == ref.shape == (N, 4 * planes, Ho, Wo), (out.shape, ref.shape)
        # bf16 activations/weights with f32 accumulation -> relaxed tolerance.
        err = float(jnp.max(jnp.abs(out - ref)))
        assert jnp.allclose(out, ref, rtol=2e-2, atol=2e-2), \
            f"case {idx}: max abs err = {err}"

    print("KERNEL_OK")
</pallas_src>

<mosaic_0001>
module attributes {stable_mosaic.version = 11 : i64} {
  func.func @_mm_bias_kernel(%arg0: i32, %arg1: i32, %arg2: memref<512x128xbf16, #tpu.memory_space<vmem>>, %arg3: memref<128x128xbf16, #tpu.memory_space<vmem>>, %arg4: memref<1x128xf32, #tpu.memory_space<vmem>>, %arg5: memref<512x128xbf16, #tpu.memory_space<vmem>>) attributes {dimension_semantics = [#tpu.dimension_semantics<parallel>, #tpu.dimension_semantics<parallel>], iteration_bounds = array<i64: 4, 1>, scalar_prefetch = 0 : i64, scratch_operands = 0 : i64, tpu.core_type = #tpu.core_type<tc>, window_params = [{transform_indices = @transform_0, window_bounds = array<i64: 512, 128>}, {transform_indices = @transform_1, window_bounds = array<i64: 128, 128>}, {transform_indices = @transform_2, window_bounds = array<i64: 1, 128>}, {transform_indices = @transform_3, window_bounds = array<i64: 512, 128>}]} {
    %c0 = arith.constant 0 : index
    %c0_0 = arith.constant 0 : index
    %0 = vector.load %arg2[%c0, %c0_0] : memref<512x128xbf16, #tpu.memory_space<vmem>>, vector<512x128xbf16>
    %c0_1 = arith.constant 0 : index
    %c0_2 = arith.constant 0 : index
    %1 = vector.load %arg3[%c0_1, %c0_2] : memref<128x128xbf16, #tpu.memory_space<vmem>>, vector<128x128xbf16>
    %cst = arith.constant dense<0.000000e+00> : vector<512x128xf32>
    %2 = tpu.matmul %0, %1, %cst {dimension_numbers = #tpu.dot_dimension_numbers<[1], [0], [0], [1], [0, 0, 1, 1], [], []>} : vector<512x128xbf16>, vector<128x128xbf16>, vector<512x128xf32> -> vector<512x128xf32>
    %c0_3 = arith.constant 0 : index
    %c0_4 = arith.constant 0 : index
    %3 = vector.load %arg4[%c0_3, %c0_4] : memref<1x128xf32, #tpu.memory_space<vmem>>, vector<1x128xf32>
    %4 = vector.broadcast %3 : vector<1x128xf32> to vector<512x128xf32>
    %5 = arith.addf %2, %4 : vector<512x128xf32>
    %cst_5 = arith.constant 0.000000e+00 : f32
    %6 = vector.broadcast %cst_5 : f32 to vector<512x128xf32>
    %7 = arith.maximumf %5, %6 : vector<512x128xf32>
    %8 = arith.truncf %7 : vector<512x128xf32> to vector<512x128xbf16>
    %c0_6 = arith.constant 0 : index
    %c0_7 = arith.constant 0 : index
    %9 = vector.load %arg5[%c0_6, %c0_7] : memref<512x128xbf16, #tpu.memory_space<vmem>>, vector<512x128xbf16>
    tpu.vector_store %arg5[%c0_6, %c0_7], %8 {strides = array<i32>} : memref<512x128xbf16, #tpu.memory_space<vmem>>, vector<512x128xbf16>,
    return
  }
  func.func @transform_0(%arg0: i32, %arg1: i32) -> (i32, i32) {
    %c0_i32 = arith.constant 0 : i32
    %c0_i32_0 = arith.constant 0 : i32
    return %arg0, %c0_i32 : i32, i32
  }
  func.func @transform_1(%arg0: i32, %arg1: i32) -> (i32, i32) {
    %c0_i32 = arith.constant 0 : i32
    %c0_i32_0 = arith.constant 0 : i32
    return %c0_i32, %arg1 : i32, i32
  }
  func.func @transform_2(%arg0: i32, %arg1: i32) -> (i32, i32) {
    %c0_i32 = arith.constant 0 : i32
    %c0_i32_0 = arith.constant 0 : i32
    return %c0_i32, %arg1 : i32, i32
  }
  func.func @transform_3(%arg0: i32, %arg1: i32) -> (i32, i32) {
    %c0_i32 = arith.constant 0 : i32
    return %arg0, %arg1 : i32, i32
  }
}

</mosaic_0001>

<bundles_post_ra>
// kernel: tpu_custom_call.1
= control target key start
LH: loop header
LB: loop body
LE: loop exit
PB: predicated region body
PF: predicated region fallthrough
CT: control target
= control target key end

     0   :  { %s2035_s0 = inlined_call_operand.hbm [shape: bf16[2048,128], index: 0, kind: input, shape index: {}]   ;;  %s2036_s1 = inlined_call_operand.hbm [shape: bf16[128,128], index: 1, kind: input, shape index: {}]   ;;  %s2037_s2 = inlined_call_operand.vmem [shape: f32[1,128], index: 2, kind: input, shape index: {}]   ;;  %s2038_s3 = inlined_call_operand.hbm [shape: bf16[2048,128], index: 3, kind: output, shape index: {}]  }
   0x1   :  { %2040 = sst [smem:[#allocation11_spill]] %s2036_s1 }
   0x2   :  { %8 = vsyncpa [#allocation3], 0 }
   0x3   :  { %10 = vsyncpa [#allocation3 + $0x1], 0 }
   0x4   :  { %11 = vsyncpa [#allocation6], 0 }
   0x5   :  { %12 = vsyncpa [#allocation4], 0 }
   0x6   :  { %14 = vsyncpa [#allocation4 + $0x1], 0  ;;  %s1740_s12 = smov 0   ;;  %s1742_s13 = smov 0  }
   0x7   :  { %s1744_s14 = smov 0   ;;  %s1746_s15 = smov 0  }
   0x8   :  { %s1748_s16 = smov 0   ;;  %s1750_s17 = smov 0  }
   0x9 LB: > { %s1054_s18 = sadd.s32 4294967295, %s1713_s17   ;;  %s1055_s19 = sadd.s32 4294967294, %s1713_s17   ;;  %s1713_s17 = sphi %s1750_s17, %s20_s17   ;;  %s1709_s16 = sphi %s1748_s16, %s2054_s16   ;;  %s1705_s15 = sphi %s1746_s15, %s2053_s15   ;;  %s1701_s14 = sphi %s1744_s14, %s2052_s14   ;;  %s1697_s13 = sphi %s1742_s13, %s2051_s13   ;;  %s1693_s12 = sphi %s1740_s12, %s2050_s12  }
   0xa   : > { %p52_p0 = scmp.ne.s32.totalorder %s1697_s13, %s1693_s12  ;;  %p1774_p1 = scmp.eq.s32.totalorder %s1054_s18, 0 }
   0xb   : > { %p1778_p2 = scmp.eq.s32.totalorder %s1054_s18, 3  ;;  %p136_p3 = scmp.eq.s32.totalorder %s1055_s19, 3 }
   0xc   : > { %p1784_p4 = por %p1774_p1, %p52_p0  ;;  %p1056_p5 = scmp.ge.s32.totalorder %s1713_s17, 1 }
   0xd   : > { %p1789_p6 = por %p136_p3, %p52_p0  ;;  %p143_p7 = scmp.lt.s32.totalorder %s1713_s17, 5 }
   0xe   : > { %s2045_s1 = sld [smem:[#allocation11_spill]]  ;;  %s1715_s28 = smov [#allocation5]  }
   0xf   : > { %p1797_p8 = pnand %p1056_p5, %p143_p7  ;;  %s158_s29 = sshll.u32 %s1715_s28, 4  ;;  %s159_s29 = int_to_ptr.vmem [resolvable:$true] %s158_s29 }
  0x10   : > { %s2039_s30 = smov 64   ;;  %s1717_s4 = smov 4  }
  0x11   : > { %p1497_p9 = pneg %p1797_p8  ;;  %s32_s5 = sadd.s32 1, %s1709_s16 }
  0x12   : > { %p34_p11 = scmp.ge.s32.totalorder %s32_s5, 4  ;;  %s39_s6 = sadd.s32 1, %s1701_s14 }
  0x13   : > { %p1498_p10 = pnand %p1497_p9, %p1774_p1  ;;  %p46_p12 = scmp.ne.s32.totalorder %s1701_s14, %s1697_s13 }
  0x14   : > { %s156_s26 = sshll.u32 %s2045_s1, 4  ;;  %p47_p13 = scmp.eq.s32.totalorder %s1713_s17, 0  ;;  %s157_s26 = int_to_ptr.hbm [resolvable:$true] %s156_s26 }
  0x15   : > { %1500 = dma.hbm_to_vmem [thread:$0]  (!%p1498_p10), %s157_s26, 1024, %s159_s29, [#allocation6], %s2039_s30, %s2039_s30, %s1717_s4  }
  0x16   : > { %s2056_s5 = smov (%p34_p11, %s32_s5), 0  ;;  %p1815_p0 = por %p47_p13, %p46_p12 }
  0x17   : > { %p1821_p3 = por %p1778_p2, %p46_p12  ;;  %s36_s9 = ssub.s32 %s1709_s16, %s2056_s5 }
  0x18   : > { %p1510_p5 = scmp.lt.s32.totalorder %s1713_s17, 4  ;;  %p37_p7 = scmp.eq.s32.totalorder %s36_s9, 0 }
  0x19   : > { %s178_s10 = sand.u32 1, %s1701_s14   ;;  %s1232_s19 = sshll.u32 %s1709_s16, 8 }
  0x1a   : > { %s1060_s11 = sshll.u32 %s178_s10, 8  ;;  %s187_s26 = scalar_lea.hbm %s2035_s0, %s1232_s19 }
  0x1b   : > { %s1830_s18 = scalar_select %p37_p7, %s1701_s14, %s39_s6  }
  0x1c   : > { %s182_s28 = scalar_lea.vmem [#allocation2], %s1060_s11  ;;  %s188_s21 = sshll.u32 %s187_s26, 4  ;;  %s189_s21 = int_to_ptr.hbm [resolvable:$true] %s188_s21 }
  0x1d   : > { %s190_s29 = sshll.u32 %s182_s28, 4  ;;  %p1502_p2 = pnand %p1510_p5, %p1815_p0  ;;  %s191_s29 = int_to_ptr.vmem [resolvable:$true] %s190_s29 }
  0x1e   : > { %s179_s30 = scalar_lea.sflag [#allocation3], %s178_s10  ;;  %s2049_s1 = smov 64  }
  0x1f   : > { %1504 = dma.hbm_to_vmem [thread:$0]  (!%p1502_p2), %s189_s21, 4096, %s191_s29, %s179_s30, %s2049_s1, %s2049_s1, %s1717_s4  }
  0x20   : > { %202 = sbr.rel (%p1797_p8) target bundleno = 336 (0x150), region = 32  ;;  %s1844_s6 = sand.u32 (!%p1797_p8), 1, %s1697_s13  }
  0x21   : > { %s1064_s9 = sshll.u32 (!%p1797_p8), %s1844_s6, 8  ;;  %s205_s11 = scalar_lea.sflag (!%p1797_p8), [#allocation3], %s1844_s6 }
  0x22   : > { %s1850_s7 = scalar_lea.vmem (!%p1797_p8), [#allocation2], %s1064_s9 }
  0x25   : > { %1680 = dma.done.wait (%p1784_p4), %s205_s11, 4096  }
  0x26   : > { %1682 = vsyncadd (%p1784_p4), %s205_s11, 4294963200 }
  0x27   : > { %1684 = dma.done.wait (%p1774_p1), [#allocation6], 1024  }
  0x28   : > { %1686 = vsyncadd (%p1774_p1), [#allocation6], 4294966272  ;;  %v1272_v0 = vld [vmem:[#allocation5 + $0x38] sm:$0xff]  ;;  %v1271_v1 = vld [vmem:[#allocation5 + $0x30] sm:$0xff]  ;;  %s1905_s22 = scalar_lea.vmem [#allocation7], %s1064_s9  ;;  %s1273_s27 = sshll.u32 %s1705_s15, 8 }
  0x29   : > { %569 = vmatpush.bf16.msra.mxu0 %v1272_v0  ;;  %1465 = vmatpush.bf16.msra.mxu1 %v1272_v0  ;;  %v1270_v2 = vld [vmem:[#allocation5 + $0x28] sm:$0xff]  ;;  %v1269_v3 = vld [vmem:[#allocation5 + $0x20] sm:$0xff]  ;;  %v1268_v4 = vld [vmem:[#allocation5 + $0x18] sm:$0xff]  ;;  %s943_s10 = scalar_lea.hbm %s2038_s3, %s1273_s27  ;;  %s944_s15 = sshll.u32 %s1905_s22, 4  ;;  %s945_s15 = int_to_ptr.vmem [resolvable:$true] %s944_s15 }
  0x2a   : > { %1466 = vmatpush.bf16.msra.mxu2 %v1272_v0  ;;  %1467 = vmatpush.bf16.msra.mxu3 %v1272_v0  ;;  %v1267_v5 = vld [vmem:[#allocation5 + $0x10] sm:$0xff]  ;;  %v1266_v6 = vld [vmem:[#allocation5 + $0x8] sm:$0xff]  ;;  %v1265_v7 = vld [vmem:[#allocation5] sm:$0xff]  ;;  %s946_s19 = sshll.u32 %s943_s10, 4  ;;  %s931_s24 = scalar_lea.sflag [#allocation4], %s1844_s6  ;;  %s947_s19 = int_to_ptr.hbm [resolvable:$true] %s946_s19 }
  0x2b   : > { %v1233_v8 = vld [vmem:[%s1850_s7] sm:$0xff]  ;;  %v1234_v12 = vld [vmem:[%s1850_s7 + $0x8] sm:$0xff]  ;;  %v1235_v16 = vld [vmem:[%s1850_s7 + $0x10] sm:$0xff]  ;;  %s1641_s25 = sshra.s32 %s947_s19, 4  ;;  %s1647_s21 = scalar_lea.hbm %s2038_s3, 1024  ;;  %s1642_s25 = int_to_ptr.hbm [resolvable:$true] %s1641_s25 }
  0x2c   : > { %v1241_v9 = vld [vmem:[%s1850_s7 + $0x40] sm:$0xff]  ;;  %v1242_v13 = vld [vmem:[%s1850_s7 + $0x48] sm:$0xff]  ;;  %v1243_v17 = vld [vmem:[%s1850_s7 + $0x50] sm:$0xff]  ;;  %s1643_s26 = scalar_lea.hbm %s1642_s25, 256  ;;  %p1648_p9 = scmp.lt.s32.totalorder %s1642_s25, %s2038_s3 }
  0x2d   : > { %570 = vmatpush.bf16.msra.mxu0 %v1271_v1  ;;  %1468 = vmatpush.bf16.msra.mxu1 %v1271_v1  ;;  %v1249_v10 = vld [vmem:[%s1850_s7 + $0x80] sm:$0xff]  ;;  %v1250_v14 = vld [vmem:[%s1850_s7 + $0x88] sm:$0xff]  ;;  %v1251_v18 = vld [vmem:[%s1850_s7 + $0x90] sm:$0xff]  ;;  %p1644_p1 = scmp.ne.s32.totalorder %s1642_s25, %s1643_s26  ;;  %p1649_p10 = scmp.lt.s32.totalorder %s1647_s21, %s1643_s26 }
  0x2e   : > { %1469 = vmatpush.bf16.msra.mxu2 %v1271_v1  ;;  %1470 = vmatpush.bf16.msra.mxu3 %v1271_v1  ;;  %v1257_v11 = vld [vmem:[%s1850_s7 + $0xc0] sm:$0xff]  ;;  %v1258_v15 = vld [vmem:[%s1850_s7 + $0xc8] sm:$0xff]  ;;  %v1259_v19 = vld [vmem:[%s1850_s7 + $0xd0] sm:$0xff] }
  0x2f   : > { %v1236_v20 = vld [vmem:[%s1850_s7 + $0x18] sm:$0xff]  ;;  %v1237_v24 = vld [vmem:[%s1850_s7 + $0x20] sm:$0xff]  ;;  %v1238_v28 = vld [vmem:[%s1850_s7 + $0x28] sm:$0xff]  ;;  %p1645_p4 = pnand %p1644_p1, %p1821_p3  ;;  %p1650_p11 = por %p1649_p10, %p1648_p9 }
  0x30   : > { %v1244_v21 = vld [vmem:[%s1850_s7 + $0x58] sm:$0xff]  ;;  %v1245_v25 = vld [vmem:[%s1850_s7 + $0x60] sm:$0xff]  ;;  %v1246_v29 = vld [vmem:[%s1850_s7 + $0x68] sm:$0xff] }
  0x31   : > { %571 = vmatpush.bf16.msra.mxu0 %v1270_v2  ;;  %1471 = vmatpush.bf16.msra.mxu1 %v1270_v2  ;;  %v1252_v22 = vld [vmem:[%s1850_s7 + $0x98] sm:$0xff]  ;;  %v1253_v26 = vld [vmem:[%s1850_s7 + $0xa0] sm:$0xff]  ;;  %v1254_v30 = vld [vmem:[%s1850_s7 + $0xa8] sm:$0xff]  ;;  %p1646_p8 = pneg %p1645_p4 }
  0x32   : > { %1472 = vmatpush.bf16.msra.mxu2 %v1270_v2  ;;  %1473 = vmatpush.bf16.msra.mxu3 %v1270_v2  ;;  %v1260_v23 = vld [vmem:[%s1850_s7 + $0xd8] sm:$0xff]  ;;  %v1261_v27 = vld [vmem:[%s1850_s7 + $0xe0] sm:$0xff]  ;;  %v1262_v31 = vld [vmem:[%s1850_s7 + $0xe8] sm:$0xff] }
  0x33   : > { %v1239_v32 = vld [vmem:[%s1850_s7 + $0x30] sm:$0xff]  ;;  %v1240_v36 = vld [vmem:[%s1850_s7 + $0x38] sm:$0xff]  ;;  %v1895_v42 = vld [vmem:[%s2037_s2] ss:$0 sm:$0xff]  ;;  %p1651_p12 = pnand %p1650_p11, %p1646_p8 }
  0x34   : > { %v1247_v33 = vld [vmem:[%s1850_s7 + $0x70] sm:$0xff]  ;;  %v1248_v37 = vld [vmem:[%s1850_s7 + $0x78] sm:$0xff] }
  0x35   : > { %572 = vmatpush.bf16.msra.mxu0 %v1269_v3  ;;  %1474 = vmatpush.bf16.msra.mxu1 %v1269_v3  ;;  %v1255_v34 = vld [vmem:[%s1850_s7 + $0xb0] sm:$0xff]  ;;  %v1256_v38 = vld [vmem:[%s1850_s7 + $0xb8] sm:$0xff] }
  0x36   : > { %1475 = vmatpush.bf16.msra.mxu2 %v1269_v3  ;;  %1476 = vmatpush.bf16.msra.mxu3 %v1269_v3  ;;  %v1263_v35 = vld [vmem:[%s1850_s7 + $0xf0] sm:$0xff]  ;;  %v1264_v39 = vld [vmem:[%s1850_s7 + $0xf8] sm:$0xff] }
  0x39   : > { %573 = vmatpush.bf16.msra.mxu0 %v1268_v4  ;;  %1477 = vmatpush.bf16.msra.mxu1 %v1268_v4 }
  0x3a   : > { %1478 = vmatpush.bf16.msra.mxu2 %v1268_v4  ;;  %1479 = vmatpush.bf16.msra.mxu3 %v1268_v4 }
  0x3d   : > { %574 = vmatpush.bf16.msra.mxu0 %v1267_v5  ;;  %1480 = vmatpush.bf16.msra.mxu1 %v1267_v5 }
  0x3e   : > { %1481 = vmatpush.bf16.msra.mxu2 %v1267_v5  ;;  %1482 = vmatpush.bf16.msra.mxu3 %v1267_v5 }
  0x41   : > { %575 = vmatpush.bf16.msra.mxu0 %v1266_v6  ;;  %1483 = vmatpush.bf16.msra.mxu1 %v1266_v6 }
  0x42   : > { %1484 = vmatpush.bf16.msra.mxu2 %v1266_v6  ;;  %1485 = vmatpush.bf16.msra.mxu3 %v1266_v6 }
  0x45   : > { %576 = vmatpush.bf16.msra.mxu0 %v1265_v7  ;;  %1486 = vmatpush.bf16.msra.mxu1 %v1265_v7 }
  0x46   : > { %1487 = vmatpush.bf16.msra.mxu2 %v1265_v7  ;;  %1488 = vmatpush.bf16.msra.mxu3 %v1265_v7 }
  0x48   : > { %577 = vmatmul.bf16.vlgmr.msra.gmra.mxu0 %v1233_v8  ;;  %617 = vmatmul.bf16.vlgmr.msra.gmra.mxu1 %v1241_v9 }
  0x49   : > { %657 = vmatmul.bf16.vlgmr.msra.gmra.mxu2 %v1249_v10  ;;  %697 = vmatmul.bf16.vlgmr.msra.gmra.mxu3 %v1257_v11 }
  0x58   : > { %582 = vmatmul.bf16.gmra.mxu0 %v1234_v12  ;;  %622 = vmatmul.bf16.gmra.mxu1 %v1242_v13 }
  0x59   : > { %662 = vmatmul.bf16.gmra.mxu2 %v1250_v14  ;;  %702 = vmatmul.bf16.gmra.mxu3 %v1258_v15 }
  0x68   : > { %587 = vmatmul.bf16.gmra.mxu0 %v1235_v16  ;;  %627 = vmatmul.bf16.gmra.mxu1 %v1243_v17 }
  0x69   : > { %667 = vmatmul.bf16.gmra.mxu2 %v1251_v18  ;;  %707 = vmatmul.bf16.gmra.mxu3 %v1259_v19 }
  0x78   : > { %592 = vmatmul.bf16.gmra.mxu0 %v1236_v20  ;;  %632 = vmatmul.bf16.gmra.mxu1 %v1244_v21 }
  0x79   : > { %672 = vmatmul.bf16.gmra.mxu2 %v1252_v22  ;;  %712 = vmatmul.bf16.gmra.mxu3 %v1260_v23 }
  0x88   : > { %597 = vmatmul.bf16.gmra.mxu0 %v1237_v24  ;;  %637 = vmatmul.bf16.gmra.mxu1 %v1245_v25 }
  0x89   : > { %677 = vmatmul.bf16.gmra.mxu2 %v1253_v26  ;;  %717 = vmatmul.bf16.gmra.mxu3 %v1261_v27 }
  0x98   : > { %602 = vmatmul.bf16.gmra.mxu0 %v1238_v28  ;;  %642 = vmatmul.bf16.gmra.mxu1 %v1246_v29 }
  0x99   : > { %682 = vmatmul.bf16.gmra.mxu2 %v1254_v30  ;;  %722 = vmatmul.bf16.gmra.mxu3 %v1262_v31 }
  0xa8   : > { %607 = vmatmul.bf16.gmra.mxu0 %v1239_v32  ;;  %647 = vmatmul.bf16.gmra.mxu1 %v1247_v33 }
  0xa9   : > { %687 = vmatmul.bf16.gmra.mxu2 %v1255_v34  ;;  %727 = vmatmul.bf16.gmra.mxu3 %v1263_v35 }
  0xb8   : > { %612 = vmatmul.bf16.gmra.mxu0 %v1240_v36  ;;  %652 = vmatmul.bf16.gmra.mxu1 %v1248_v37 }
  0xb9   : > { %692 = vmatmul.bf16.gmra.mxu2 %v1256_v38  ;;  %732 = vmatmul.bf16.gmra.mxu3 %v1264_v39 }
  0xc5   : > { %v578_v40 = vpop.f32.mrf.mxu0  ;;  %v618_v41 = vpop.f32.mrf.mxu1 }
  0xc6   : > { %v579_v43 = vadd.f32 %v1895_v42, %v578_v40  ;;  %v619_v44 = vadd.f32 %v1895_v42, %v618_v41 }
  0xc8   : > { %v738_v51 = vmax.f32 %v579_v43, 0.0  ;;  %v754_v52 = vmax.f32 %v619_v44, 0.0 }
  0xcc   : > { %v658_v45 = vpop.f32.mrf.mxu2  ;;  %v698_v46 = vpop.f32.mrf.mxu3 }
  0xcd   : > { %v580_v47 = vpop.f32.mrf.mxu0  ;;  %v620_v48 = vpop.f32.mrf.mxu1  ;;  %v659_v57 = vadd.f32 %v1895_v42, %v658_v45  ;;  %v699_v58 = vadd.f32 %v1895_v42, %v698_v46 }
  0xce   : > { %v581_v49 = vadd.f32 %v1895_v42, %v580_v47  ;;  %v621_v50 = vadd.f32 %v1895_v42, %v620_v48 }
  0xcf   : > { %v770_v1 = vmax.f32 %v659_v57, 0.0  ;;  %v786_v2 = vmax.f32 %v699_v58, 0.0 }
  0xd0   : > { %v739_v53 = vmax.f32 %v581_v49, 0.0  ;;  %v755_v54 = vmax.f32 %v621_v50, 0.0 }
  0xd2   : > { %v1277_v55 = vpack.c.bf16 %v739_v53, %v738_v51  ;;  %v1317_v56 = vpack.c.bf16 %v755_v54, %v754_v52 }
  0xd4   : > { %1278 = vst [vmem:[%s1905_s22] sm:$0xff] %v1277_v55   ;;  %v660_v59 = vpop.f32.mrf.mxu2  ;;  %v700_v60 = vpop.f32.mrf.mxu3 }
  0xd5   : > { %1441 = vst [vmem:[%s1905_s22 + $0x40] sm:$0xff] %v1317_v56   ;;  %v661_v61 = vadd.f32 %v1895_v42, %v660_v59  ;;  %v701_v62 = vadd.f32 %v1895_v42, %v700_v60  ;;  %v583_v63 = vpop.f32.mrf.mxu0  ;;  %v623_v0 = vpop.f32.mrf.mxu1 }
  0xd6   : > { %v584_v7 = vadd.f32 %v1895_v42, %v583_v63  ;;  %v624_v8 = vadd.f32 %v1895_v42, %v623_v0 }
  0xd7   : > { %v771_v3 = vmax.f32 %v661_v61, 0.0  ;;  %v787_v4 = vmax.f32 %v701_v62, 0.0 }
  0xd8   : > { %v740_v15 = vmax.f32 %v584_v7, 0.0  ;;  %v756_v16 = vmax.f32 %v624_v8, 0.0 }
  0xd9   : > { %v1357_v5 = vpack.c.bf16 %v771_v3, %v770_v1  ;;  %v1397_v6 = vpack.c.bf16 %v787_v4, %v786_v2 }
  0xdb   : > { %1449 = vst [vmem:[%s1905_s22 + $0x80] sm:$0xff] %v1357_v5  }
  0xdc   : > { %1457 = vst [vmem:[%s1905_s22 + $0xc0] sm:$0xff] %v1397_v6   ;;  %v663_v9 = vpop.f32.mrf.mxu2  ;;  %v703_v10 = vpop.f32.mrf.mxu3 }
  0xdd   : > { %v585_v11 = vpop.f32.mrf.mxu0  ;;  %v625_v12 = vpop.f32.mrf.mxu1  ;;  %v664_v21 = vadd.f32 %v1895_v42, %v663_v9  ;;  %v704_v22 = vadd.f32 %v1895_v42, %v703_v10 }
  0xde   : > { %v586_v13 = vadd.f32 %v1895_v42, %v585_v11  ;;  %v626_v14 = vadd.f32 %v1895_v42, %v625_v12 }
  0xdf   : > { %v772_v29 = vmax.f32 %v664_v21, 0.0  ;;  %v788_v30 = vmax.f32 %v704_v22, 0.0 }
  0xe0   : > { %v741_v17 = vmax.f32 %v586_v13, 0.0  ;;  %v757_v18 = vmax.f32 %v626_v14, 0.0 }
  0xe2   : > { %v1282_v19 = vpack.c.bf16 %v741_v17, %v740_v15  ;;  %v1322_v20 = vpack.c.bf16 %v757_v18, %v756_v16 }
  0xe4   : > { %1434 = vst [vmem:[%s1905_s22 + $0x8] sm:$0xff] %v1282_v19   ;;  %v665_v23 = vpop.f32.mrf.mxu2  ;;  %v705_v24 = vpop.f32.mrf.mxu3 }
  0xe5   : > { %1442 = vst [vmem:[%s1905_s22 + $0x48] sm:$0xff] %v1322_v20   ;;  %v666_v25 = vadd.f32 %v1895_v42, %v665_v23  ;;  %v706_v26 = vadd.f32 %v1895_v42, %v705_v24  ;;  %v588_v27 = vpop.f32.mrf.mxu0  ;;  %v628_v28 = vpop.f32.mrf.mxu1 }
  0xe6   : > { %v589_v35 = vadd.f32 %v1895_v42, %v588_v27  ;;  %v629_v36 = vadd.f32 %v1895_v42, %v628_v28 }
  0xe7   : > { %v773_v31 = vmax.f32 %v666_v25, 0.0  ;;  %v789_v32 = vmax.f32 %v706_v26, 0.0 }
  0xe8   : > { %v742_v44 = vmax.f32 %v589_v35, 0.0  ;;  %v758_v45 = vmax.f32 %v629_v36, 0.0 }
  0xe9   : > { %v1362_v33 = vpack.c.bf16 %v773_v31, %v772_v29  ;;  %v1402_v34 = vpack.c.bf16 %v789_v32, %v788_v30 }
  0xeb   : > { %1450 = vst [vmem:[%s1905_s22 + $0x88] sm:$0xff] %v1362_v33  }
  0xec   : > { %1458 = vst [vmem:[%s1905_s22 + $0xc8] sm:$0xff] %v1402_v34   ;;  %v668_v37 = vpop.f32.mrf.mxu2  ;;  %v708_v38 = vpop.f32.mrf.mxu3 }
  0xed   : > { %v590_v39 = vpop.f32.mrf.mxu0  ;;  %v630_v40 = vpop.f32.mrf.mxu1  ;;  %v669_v50 = vadd.f32 %v1895_v42, %v668_v37  ;;  %v709_v51 = vadd.f32 %v1895_v42, %v708_v38 }
  0xee   : > { %v591_v41 = vadd.f32 %v1895_v42, %v590_v39  ;;  %v631_v43 = vadd.f32 %v1895_v42, %v630_v40 }
  0xef   : > { %v774_v58 = vmax.f32 %v669_v50, 0.0  ;;  %v790_v59 = vmax.f32 %v709_v51, 0.0 }
  0xf0   : > { %v743_v46 = vmax.f32 %v591_v41, 0.0  ;;  %v759_v47 = vmax.f32 %v631_v43, 0.0 }
  0xf2   : > { %v1287_v48 = vpack.c.bf16 %v743_v46, %v742_v44  ;;  %v1327_v49 = vpack.c.bf16 %v759_v47, %v758_v45 }
  0xf4   : > { %1435 = vst [vmem:[%s1905_s22 + $0x10] sm:$0xff] %v1287_v48   ;;  %v670_v52 = vpop.f32.mrf.mxu2  ;;  %v710_v53 = vpop.f32.mrf.mxu3 }
  0xf5   : > { %1443 = vst [vmem:[%s1905_s22 + $0x50] sm:$0xff] %v1327_v49   ;;  %v671_v54 = vadd.f32 %v1895_v42, %v670_v52  ;;  %v711_v55 = vadd.f32 %v1895_v42, %v710_v53  ;;  %v593_v56 = vpop.f32.mrf.mxu0  ;;  %v633_v57 = vpop.f32.mrf.mxu1 }
  0xf6   : > { %v594_v0 = vadd.f32 %v1895_v42, %v593_v56  ;;  %v634_v1 = vadd.f32 %v1895_v42, %v633_v57 }
  0xf7   : > { %v775_v60 = vmax.f32 %v671_v54, 0.0  ;;  %v791_v61 = vmax.f32 %v711_v55, 0.0 }
  0xf8   : > { %v744_v8 = vmax.f32 %v594_v0, 0.0  ;;  %v760_v9 = vmax.f32 %v634_v1, 0.0 }
  0xf9   : > { %v1367_v62 = vpack.c.bf16 %v775_v60, %v774_v58  ;;  %v1407_v63 = vpack.c.bf16 %v791_v61, %v790_v59 }
  0xfb   : > { %1451 = vst [vmem:[%s1905_s22 + $0x90] sm:$0xff] %v1367_v62  }
  0xfc   : > { %1459 = vst [vmem:[%s1905_s22 + $0xd0] sm:$0xff] %v1407_v63   ;;  %v673_v2 = vpop.f32.mrf.mxu2  ;;  %v713_v3 = vpop.f32.mrf.mxu3 }
  0xfd   : > { %v595_v4 = vpop.f32.mrf.mxu0  ;;  %v635_v5 = vpop.f32.mrf.mxu1  ;;  %v674_v14 = vadd.f32 %v1895_v42, %v673_v2  ;;  %v714_v15 = vadd.f32 %v1895_v42, %v713_v3 }
  0xfe   : > { %v596_v6 = vadd.f32 %v1895_v42, %v595_v4  ;;  %v636_v7 = vadd.f32 %v1895_v42, %v635_v5 }
  0xff   : > { %v776_v22 = vmax.f32 %v674_v14, 0.0  ;;  %v792_v23 = vmax.f32 %v714_v15, 0.0 }
 0x100   : > { %v745_v10 = vmax.f32 %v596_v6, 0.0  ;;  %v761_v11 = vmax.f32 %v636_v7, 0.0 }
 0x102   : > { %v1292_v12 = vpack.c.bf16 %v745_v10, %v744_v8  ;;  %v1332_v13 = vpack.c.bf16 %v761_v11, %v760_v9 }
 0x104   : > { %1436 = vst [vmem:[%s1905_s22 + $0x18] sm:$0xff] %v1292_v12   ;;  %v675_v16 = vpop.f32.mrf.mxu2  ;;  %v715_v17 = vpop.f32.mrf.mxu3 }
 0x105   : > { %1444 = vst [vmem:[%s1905_s22 + $0x58] sm:$0xff] %v1332_v13   ;;  %v676_v18 = vadd.f32 %v1895_v42, %v675_v16  ;;  %v716_v19 = vadd.f32 %v1895_v42, %v715_v17  ;;  %v598_v20 = vpop.f32.mrf.mxu0  ;;  %v638_v21 = vpop.f32.mrf.mxu1 }
 0x106   : > { %v599_v28 = vadd.f32 %v1895_v42, %v598_v20  ;;  %v639_v29 = vadd.f32 %v1895_v42, %v638_v21 }
 0x107   : > { %v777_v24 = vmax.f32 %v676_v18, 0.0  ;;  %v793_v25 = vmax.f32 %v716_v19, 0.0 }
 0x108   : > { %v746_v36 = vmax.f32 %v599_v28, 0.0  ;;  %v762_v37 = vmax.f32 %v639_v29, 0.0 }
 0x109   : > { %v1372_v26 = vpack.c.bf16 %v777_v24, %v776_v22  ;;  %v1412_v27 = vpack.c.bf16 %v793_v25, %v792_v23 }
 0x10b   : > { %1452 = vst [vmem:[%s1905_s22 + $0x98] sm:$0xff] %v1372_v26  }
 0x10c   : > { %1460 = vst [vmem:[%s1905_s22 + $0xd8] sm:$0xff] %v1412_v27   ;;  %v678_v30 = vpop.f32.mrf.mxu2  ;;  %v718_v31 = vpop.f32.mrf.mxu3 }
 0x10d   : > { %v600_v32 = vpop.f32.mrf.mxu0  ;;  %v640_v33 = vpop.f32.mrf.mxu1  ;;  %v679_v43 = vadd.f32 %v1895_v42, %v678_v30  ;;  %v719_v44 = vadd.f32 %v1895_v42, %v718_v31 }
 0x10e   : > { %v601_v34 = vadd.f32 %v1895_v42, %v600_v32  ;;  %v641_v35 = vadd.f32 %v1895_v42, %v640_v33 }
 0x10f   : > { %v778_v51 = vmax.f32 %v679_v43, 0.0  ;;  %v794_v52 = vmax.f32 %v719_v44, 0.0 }
 0x110   : > { %v747_v38 = vmax.f32 %v601_v34, 0.0  ;;  %v763_v39 = vmax.f32 %v641_v35, 0.0 }
 0x112   : > { %v1297_v40 = vpack.c.bf16 %v747_v38, %v746_v36  ;;  %v1337_v41 = vpack.c.bf16 %v763_v39, %v762_v37 }
 0x114   : > { %1437 = vst [vmem:[%s1905_s22 + $0x20] sm:$0xff] %v1297_v40   ;;  %v680_v45 = vpop.f32.mrf.mxu2  ;;  %v720_v46 = vpop.f32.mrf.mxu3 }
 0x115   : > { %1445 = vst [vmem:[%s1905_s22 + $0x60] sm:$0xff] %v1337_v41   ;;  %v681_v47 = vadd.f32 %v1895_v42, %v680_v45  ;;  %v721_v48 = vadd.f32 %v1895_v42, %v720_v46  ;;  %v603_v49 = vpop.f32.mrf.mxu0  ;;  %v643_v50 = vpop.f32.mrf.mxu1 }
 0x116   : > { %v604_v57 = vadd.f32 %v1895_v42, %v603_v49  ;;  %v644_v58 = vadd.f32 %v1895_v42, %v643_v50 }
 0x117   : > { %v779_v53 = vmax.f32 %v681_v47, 0.0  ;;  %v795_v54 = vmax.f32 %v721_v48, 0.0 }
 0x118   : > { %v748_v1 = vmax.f32 %v604_v57, 0.0  ;;  %v764_v2 = vmax.f32 %v644_v58, 0.0 }
 0x119   : > { %v1377_v55 = vpack.c.bf16 %v779_v53, %v778_v51  ;;  %v1417_v56 = vpack.c.bf16 %v795_v54, %v794_v52 }
 0x11b   : > { %1453 = vst [vmem:[%s1905_s22 + $0xa0] sm:$0xff] %v1377_v55  }
 0x11c   : > { %1461 = vst [vmem:[%s1905_s22 + $0xe0] sm:$0xff] %v1417_v56   ;;  %v683_v59 = vpop.f32.mrf.mxu2  ;;  %v723_v60 = vpop.f32.mrf.mxu3 }
 0x11d   : > { %v605_v61 = vpop.f32.mrf.mxu0  ;;  %v645_v62 = vpop.f32.mrf.mxu1  ;;  %v684_v7 = vadd.f32 %v1895_v42, %v683_v59  ;;  %v724_v8 = vadd.f32 %v1895_v42, %v723_v60 }
 0x11e   : > { %v606_v63 = vadd.f32 %v1895_v42, %v605_v61  ;;  %v646_v0 = vadd.f32 %v1895_v42, %v645_v62 }
 0x11f   : > { %v780_v15 = vmax.f32 %v684_v7, 0.0  ;;  %v796_v16 = vmax.f32 %v724_v8, 0.0 }
 0x120   : > { %v749_v3 = vmax.f32 %v606_v63, 0.0  ;;  %v765_v4 = vmax.f32 %v646_v0, 0.0 }
 0x122   : > { %v1302_v5 = vpack.c.bf16 %v749_v3, %v748_v1  ;;  %v1342_v6 = vpack.c.bf16 %v765_v4, %v764_v2 }
 0x124   : > { %1438 = vst [vmem:[%s1905_s22 + $0x28] sm:$0xff] %v1302_v5   ;;  %v685_v9 = vpop.f32.mrf.mxu2  ;;  %v725_v10 = vpop.f32.mrf.mxu3 }
 0x125   : > { %1446 = vst [vmem:[%s1905_s22 + $0x68] sm:$0xff] %v1342_v6   ;;  %v686_v11 = vadd.f32 %v1895_v42, %v685_v9  ;;  %v726_v12 = vadd.f32 %v1895_v42, %v725_v10  ;;  %v608_v13 = vpop.f32.mrf.mxu0  ;;  %v648_v14 = vpop.f32.mrf.mxu1 }
 0x126   : > { %v609_v21 = vadd.f32 %v1895_v42, %v608_v13  ;;  %v649_v22 = vadd.f32 %v1895_v42, %v648_v14 }
 0x127   : > { %v781_v17 = vmax.f32 %v686_v11, 0.0  ;;  %v797_v18 = vmax.f32 %v726_v12, 0.0 }
 0x128   : > { %v750_v29 = vmax.f32 %v609_v21, 0.0  ;;  %v766_v30 = vmax.f32 %v649_v22, 0.0 }
 0x129   : > { %v1382_v19 = vpack.c.bf16 %v781_v17, %v780_v15  ;;  %v1422_v20 = vpack.c.bf16 %v797_v18, %v796_v16 }
 0x12b   : > { %1454 = vst [vmem:[%s1905_s22 + $0xa8] sm:$0xff] %v1382_v19  }
 0x12c   : > { %1462 = vst [vmem:[%s1905_s22 + $0xe8] sm:$0xff] %v1422_v20   ;;  %v688_v23 = vpop.f32.mrf.mxu2  ;;  %v728_v24 = vpop.f32.mrf.mxu3 }
 0x12d   : > { %v610_v25 = vpop.f32.mrf.mxu0  ;;  %v650_v26 = vpop.f32.mrf.mxu1  ;;  %v689_v35 = vadd.f32 %v1895_v42, %v688_v23  ;;  %v729_v36 = vadd.f32 %v1895_v42, %v728_v24 }
 0x12e   : > { %v611_v27 = vadd.f32 %v1895_v42, %v610_v25  ;;  %v651_v28 = vadd.f32 %v1895_v42, %v650_v26 }
 0x12f   : > { %v782_v44 = vmax.f32 %v689_v35, 0.0  ;;  %v798_v45 = vmax.f32 %v729_v36, 0.0 }
 0x130   : > { %v751_v31 = vmax.f32 %v611_v27, 0.0  ;;  %v767_v32 = vmax.f32 %v651_v28, 0.0 }
 0x132   : > { %v1307_v33 = vpack.c.bf16 %v751_v31, %v750_v29  ;;  %v1347_v34 = vpack.c.bf16 %v767_v32, %v766_v30 }
 0x134   : > { %1439 = vst [vmem:[%s1905_s22 + $0x30] sm:$0xff] %v1307_v33   ;;  %v690_v37 = vpop.f32.mrf.mxu2  ;;  %v730_v38 = vpop.f32.mrf.mxu3 }
 0x135   : > { %1447 = vst [vmem:[%s1905_s22 + $0x70] sm:$0xff] %v1347_v34   ;;  %v691_v39 = vadd.f32 %v1895_v42, %v690_v37  ;;  %v731_v40 = vadd.f32 %v1895_v42, %v730_v38  ;;  %v613_v41 = vpop.f32.mrf.mxu0  ;;  %v653_v43 = vpop.f32.mrf.mxu1 }
 0x136   : > { %v614_v50 = vadd.f32 %v1895_v42, %v613_v41  ;;  %v654_v51 = vadd.f32 %v1895_v42, %v653_v43 }
 0x137   : > { %v783_v46 = vmax.f32 %v691_v39, 0.0  ;;  %v799_v47 = vmax.f32 %v731_v40, 0.0 }
 0x138   : > { %v752_v58 = vmax.f32 %v614_v50, 0.0  ;;  %v768_v59 = vmax.f32 %v654_v51, 0.0 }
 0x139   : > { %v1387_v48 = vpack.c.bf16 %v783_v46, %v782_v44  ;;  %v1427_v49 = vpack.c.bf16 %v799_v47, %v798_v45 }
 0x13b   : > { %1455 = vst [vmem:[%s1905_s22 + $0xb0] sm:$0xff] %v1387_v48  }
 0x13c   : > { %1463 = vst [vmem:[%s1905_s22 + $0xf0] sm:$0xff] %v1427_v49   ;;  %v693_v52 = vpop.f32.mrf.mxu2  ;;  %v733_v53 = vpop.f32.mrf.mxu3 }
 0x13d   : > { %v615_v54 = vpop.f32.mrf.mxu0  ;;  %v655_v55 = vpop.f32.mrf.mxu1  ;;  %v694_v0 = vadd.f32 %v1895_v42, %v693_v52  ;;  %v734_v1 = vadd.f32 %v1895_v42, %v733_v53 }
 0x13e   : > { %v616_v56 = vadd.f32 %v1895_v42, %v615_v54  ;;  %v656_v57 = vadd.f32 %v1895_v42, %v655_v55 }
 0x13f   : > { %v784_v6 = vmax.f32 %v694_v0, 0.0  ;;  %v800_v7 = vmax.f32 %v734_v1, 0.0 }
 0x140   : > { %v753_v60 = vmax.f32 %v616_v56, 0.0  ;;  %v769_v61 = vmax.f32 %v656_v57, 0.0 }
 0x142   : > { %v1312_v62 = vpack.c.bf16 %v753_v60, %v752_v58  ;;  %v1352_v63 = vpack.c.bf16 %v769_v61, %v768_v59 }
 0x144   : > { %1440 = vst [vmem:[%s1905_s22 + $0x38] sm:$0xff] %v1312_v62   ;;  %v695_v2 = vpop.f32.mrf.mxu2  ;;  %v735_v3 = vpop.f32.mrf.mxu3 }
 0x145   : > { %1448 = vst [vmem:[%s1905_s22 + $0x78] sm:$0xff] %v1352_v63   ;;  %v696_v4 = vadd.f32 %v1895_v42, %v695_v2  ;;  %v736_v5 = vadd.f32 %v1895_v42, %v735_v3 }
 0x147   : > { %v785_v8 = vmax.f32 %v696_v4, 0.0  ;;  %v801_v9 = vmax.f32 %v736_v5, 0.0 }
 0x149   : > { %v1392_v10 = vpack.c.bf16 %v785_v8, %v784_v6  ;;  %v1432_v11 = vpack.c.bf16 %v801_v9, %v800_v7 }
 0x14b   : > { %1456 = vst [vmem:[%s1905_s22 + $0xb8] sm:$0xff] %v1392_v10  }
 0x14c   : > { %1464 = vst [vmem:[%s1905_s22 + $0xf8] sm:$0xff] %v1432_v11  }
 0x14d   : > { %1654 = shalt.err (!%p1651_p12)
}
 0x14e   : > { %s1718_s6 = smov 64   ;;  %s1719_s7 = smov 4  }
 0x14f   : > { %1495 = dma.vmem_to_hbm [thread:$0]  (%p1821_p3), %s945_s15, 4096, %s947_s19, %s931_s24, %s1718_s6, %s1718_s6, %s1719_s7  }
 0x150 PF: > { %p1512_p13 = scmp.ge.s32.totalorder %s1713_s17, 2  ;;  %s961_s1 = sand.u32 1, %s1693_s12  }
 0x151   : > { %s962_s20 = scalar_lea.sflag [#allocation4], %s961_s1 }
 0x152   : > { %p1506_p0 = pnand %p1512_p13, %p1789_p6 }
 0x154   : > { %p1507_p5 = pneg %p1506_p0 }
 0x156   : > { %1688 = dma.done.wait (%p1507_p5), %s962_s20, 4096  }
 0x157   : > { %1690 = vsyncadd (%p1507_p5), %s962_s20, 4294963200  ;;  %s20_s17 = sadd.s32 1, %s1713_s17   ;;  %s2050_s12 = smov %s1697_s13 }
 0x158   : > { %p17_p7 = scmp.ge.s32.totalorder %s20_s17, 6   ;;  %s2051_s13 = smov %s1701_s14 }
 0x159   : > { %s2052_s14 = smov %s1830_s18  ;;  %s2053_s15 = smov %s1709_s16 }
 0x15a   : > { %s2054_s16 = smov %s2056_s5  ;;  %19 = sbr.rel (!%p17_p7) target bundleno = 9 (0x9), region = 85 }
 0x15f   :  { %968 = vsyncpa [#allocation3], 1 }
 0x160   :  { %970 = vsyncpa [#allocation3 + $0x1], 1 }
 0x161   :  { %971 = vsyncpa [#allocation6], 1 }
 0x162   :  { %972 = vsyncpa [#allocation4], 1 }
 0x163   :  { %974 = vsyncpa [#allocation4 + $0x1], 1 }

</bundles_post_ra>
